<compile_context>
chip_gen: v7x
topology: tpu7x:2x2x1
jax: 0.10.0
libtpu: 0.0.40
codegen_flags: <defaults>
</compile_context>

<pallas_src>
import jax
import jax.numpy as jnp
from jax import lax
from jax.experimental import pallas as pl
from jax.experimental.pallas import tpu as pltpu

_EPS = 1e-12  # F.normalize default eps


def _log_euclid_kernel(
    i_idx_ref, j_idx_ref,                       # scalar prefetch (SMEM)
    fs_i_ref, fs_j_ref, ft_i_ref, ft_j_ref,     # (tm, D) feature tiles
    invs_i_ref, invs_j_ref, invt_i_ref, invt_j_ref,  # (tm,1)/(1,tm) inverse norms
    out_ref,                                    # (1, 1) f32 output
    acc_ref,                                    # (1, 1) f32 VMEM scratch accumulator
):
    t = pl.program_id(0)

    @pl.when(t == 0)
    def _init():
        acc_ref[...] = jnp.zeros_like(acc_ref)

    # Transpose-free Gram tiles on the MXU: contract dim 1 of both operands.
    dn = (((1,), (1,)), ((), ()))
    gs = lax.dot_general(fs_i_ref[...], fs_j_ref[...], dn,
                         preferred_element_type=jnp.float32)
    gt = lax.dot_general(ft_i_ref[...], ft_j_ref[...], dn,
                         preferred_element_type=jnp.float32)

    # Cosine-similarity tiles via post-matmul inverse-norm scaling (f32).
    # The "1 - ..." of the cosine distance cancels in the difference.
    sim_s = gs * invs_i_ref[...] * invs_j_ref[...]   # (tm,1) and (1,tn) broadcasts
    sim_t = gt * invt_i_ref[...] * invt_j_ref[...]
    diff = sim_t - sim_s

    # diff is symmetric and we only visit j >= i: off-diagonal tiles count twice.
    w = jnp.where(i_idx_ref[t] == j_idx_ref[t], 1.0, 2.0).astype(jnp.float32)
    acc_ref[...] += w * jnp.sum(diff * diff, keepdims=True)

    @pl.when(t == pl.num_programs(0) - 1)
    def _finalize():
        out_ref[...] = jnp.sqrt(acc_ref[...])


def log_euclid_loss(feats_source: jax.Array, feats_target: jax.Array,
                    *, tile: int = 256) -> jax.Array:
    """Pallas implementation of LogEuclidLoss(log=False).forward. Returns a scalar."""
    assert feats_source.ndim == 2 and feats_target.ndim == 2
    assert feats_source.shape == feats_target.shape
    n, d = feats_source.shape

    # Per-row inverse L2 norms (tiny O(N*D) work; matches F.normalize eps handling).
    def inv_norm(x):
        xf = x.astype(jnp.float32)
        ss = jnp.sum(xf * xf, axis=1)
        return 1.0 / jnp.maximum(jnp.sqrt(ss), _EPS)

    inv_s = inv_norm(feats_source)
    inv_t = inv_norm(feats_target)

    # Tile size / padding.  Multi-tile path needs tm to be a lane multiple (128);
    # small batches fall back to a single full-size (8-aligned) tile.
    if n > tile:
        assert tile % 128 == 0, "tile must be a multiple of 128 for multi-tile runs"
        tm = tile
    else:
        tm = max(8, -(-n // 8) * 8)
    n_pad = -(-n // tm) * tm
    pad = n_pad - n
    if pad:
        feats_source = jnp.pad(feats_source, ((0, pad), (0, 0)))
        feats_target = jnp.pad(feats_target, ((0, pad), (0, 0)))
        # Zero inverse norms on padded rows -> their (zero) Gram entries contribute 0.
        inv_s = jnp.pad(inv_s, (0, pad))
        inv_t = jnp.pad(inv_t, (0, pad))

    inv_s_row = inv_s.reshape(n_pad, 1)
    inv_s_col = inv_s.reshape(1, n_pad)
    inv_t_row = inv_t.reshape(n_pad, 1)
    inv_t_col = inv_t.reshape(1, n_pad)

    # Upper-triangular tile-pair schedule (diff matrix is symmetric).
    nt = n_pad // tm
    pairs = [(a, b) for a in range(nt) for b in range(a, nt)]
    i_idx = jnp.asarray([p[0] for p in pairs], dtype=jnp.int32)
    j_idx = jnp.asarray([p[1] for p in pairs], dtype=jnp.int32)
    num_tiles = len(pairs)

    def row_map(t, ii, jj):
        return (ii[t], 0)

    def col_map(t, ii, jj):
        return (jj[t], 0)

    def col_map_wide(t, ii, jj):
        return (0, jj[t])

    feat_spec_row = pl.BlockSpec((tm, d), row_map)
    feat_spec_col = pl.BlockSpec((tm, d), col_map)
    inv_spec_row = pl.BlockSpec((tm, 1), row_map)
    inv_spec_col = pl.BlockSpec((1, tm), col_map_wide)

    itemsize = jnp.dtype(feats_source.dtype).itemsize
    # Rough VMEM need: 4 double-buffered (tm, d) feature tiles + two (tm, tm) f32
    # Gram tiles + slack.  Keep headroom under v7x's 64 MiB physical VMEM.
    vmem_need = 2 * 4 * tm * d * itemsize + 2 * tm * tm * 4 + (2 << 20)
    vmem_limit = int(min(max(2 * vmem_need, 32 * 1024 * 1024), 64 * 1024 * 1024))

    cost = pl.CostEstimate(
        flops=2 * 2 * n_pad * n_pad * d,
        transcendentals=0,
        bytes_accessed=4 * num_tiles * tm * d * itemsize,
    )

    grid_spec = pltpu.PrefetchScalarGridSpec(
        num_scalar_prefetch=2,
        grid=(num_tiles,),
        in_specs=[
            feat_spec_row,   # feats_source row tiles
            feat_spec_col,   # feats_source col tiles
            feat_spec_row,   # feats_target row tiles
            feat_spec_col,   # feats_target col tiles
            inv_spec_row,    # inv_s rows
            inv_spec_col,    # inv_s cols
            inv_spec_row,    # inv_t rows
            inv_spec_col,    # inv_t cols
        ],
        out_specs=pl.BlockSpec((1, 1), lambda t, ii, jj: (0, 0)),
        scratch_shapes=[pltpu.VMEM((1, 1), jnp.float32)],
    )

    out = pl.pallas_call(
        _log_euclid_kernel,
        out_shape=jax.ShapeDtypeStruct((1, 1), jnp.float32),
        grid_spec=grid_spec,
        compiler_params=pltpu.CompilerParams(
            dimension_semantics=("arbitrary",),   # grid carries the accumulator
            vmem_limit_bytes=vmem_limit,
        ),
        cost_estimate=cost,
    )(
        i_idx, j_idx,
        feats_source, feats_source,
        feats_target, feats_target,
        inv_s_row, inv_s_col,
        inv_t_row, inv_t_col,
    )
    return out[0, 0]


def _reference(feats_source, feats_target):
    """Pure-JAX reference of the PyTorch forward for sanity checking."""
    def cosine_dist(x):
        xn = x / jnp.maximum(jnp.linalg.norm(x, axis=1, keepdims=True), _EPS)
        return 1.0 - xn @ xn.T

    diff = cosine_dist(feats_source) - cosine_dist(feats_target)
    return jnp.sqrt(jnp.sum(diff * diff))


if __name__ == "__main__":
    key = jax.random.PRNGKey(0)
    k_s, k_t, k_s2, k_t2 = jax.random.split(key, 4)

    # 1) Small shape consistent with the module: a batch of feature vectors.
    batch, feat_dim = 8, 32
    fs = jax.random.normal(k_s, (batch, feat_dim), dtype=jnp.float32)
    ft = jax.random.normal(k_t, (batch, feat_dim), dtype=jnp.float32)

    loss = log_euclid_loss(fs, ft)
    jax.block_until_ready(loss)
    ref = _reference(fs, ft)
    assert jnp.allclose(loss, ref, atol=1e-5, rtol=1e-5), (loss, ref)

    # 2) Slightly larger batch with a small tile to exercise the tiled,
    #    upper-triangular (weight-2) accumulation path and row padding.
    batch2, feat_dim2 = 300, 64
    fs2 = jax.random.normal(k_s2, (batch2, feat_dim2), dtype=jnp.float32)
    ft2 = jax.random.normal(k_t2, (batch2, feat_dim2), dtype=jnp.float32)

    loss2 = log_euclid_loss(fs2, ft2, tile=128)
    jax.block_until_ready(loss2)
    ref2 = _reference(fs2, ft2)
    assert jnp.allclose(loss2, ref2, atol=1e-4, rtol=1e-4), (loss2, ref2)

    print("KERNEL_OK")
</pallas_src>

<mosaic_0001>
module attributes {stable_mosaic.version = 11 : i64} {
  func.func @_log_euclid_kernel(%arg0: i32, %arg1: memref<1xi32, #tpu.memory_space<smem>>, %arg2: memref<1xi32, #tpu.memory_space<smem>>, %arg3: memref<8x32xf32, #tpu.memory_space<vmem>>, %arg4: memref<8x32xf32, #tpu.memory_space<vmem>>, %arg5: memref<8x32xf32, #tpu.memory_space<vmem>>, %arg6: memref<8x32xf32, #tpu.memory_space<vmem>>, %arg7: memref<8x1xf32, #tpu.memory_space<vmem>>, %arg8: memref<1x8xf32, #tpu.memory_space<vmem>>, %arg9: memref<8x1xf32, #tpu.memory_space<vmem>>, %arg10: memref<1x8xf32, #tpu.memory_space<vmem>>, %arg11: memref<1x1xf32, #tpu.memory_space<vmem>>, %arg12: memref<1x1xf32, #tpu.memory_space<vmem>>) attributes {dimension_semantics = [#tpu.dimension_semantics<arbitrary>], iteration_bounds = array<i64: 1>, scalar_prefetch = 2 : i64, scratch_operands = 1 : i64, tpu.core_type = #tpu.core_type<tc>, window_params = [{transform_indices = @transform_0, window_bounds = array<i64: 8, 32>}, {transform_indices = @transform_1, window_bounds = array<i64: 8, 32>}, {transform_indices = @transform_2, window_bounds = array<i64: 8, 32>}, {transform_indices = @transform_3, window_bounds = array<i64: 8, 32>}, {transform_indices = @transform_4, window_bounds = array<i64: 8, 1>}, {transform_indices = @transform_5, window_bounds = array<i64: 1, 8>}, {transform_indices = @transform_6, window_bounds = array<i64: 8, 1>}, {transform_indices = @transform_7, window_bounds = array<i64: 1, 8>}, {pipeline_mode = #tpu.pipeline_mode<synchronous>, transform_indices = @transform_8, window_bounds = array<i64: 1, 1>}]} {
    %c0_i32 = arith.constant 0 : i32
    %0 = arith.cmpi eq, %arg0, %c0_i32 : i32
    %1 = arith.extui %0 : i1 to i32
    %c0_i32_0 = arith.constant 0 : i32
    %2 = arith.cmpi ne, %1, %c0_i32_0 : i32
    scf.if %2 {
      %cst_26 = arith.constant 0.000000e+00 : f32
      %42 = vector.broadcast %cst_26 : f32 to vector<1x1xf32>
      %c0_27 = arith.constant 0 : index
      %c0_28 = arith.constant 0 : index
      %43 = vector.load %arg12[%c0_27, %c0_28] : memref<1x1xf32, #tpu.memory_space<vmem>>, vector<1x1xf32>
      tpu.vector_store %arg12[%c0_27, %c0_28], %42 {strides = array<i32>} : memref<1x1xf32, #tpu.memory_space<vmem>>, vector<1x1xf32>,
    } else {
    }
    %c0 = arith.constant 0 : index
    %c0_1 = arith.constant 0 : index
    %3 = vector.load %arg3[%c0, %c0_1] : memref<8x32xf32, #tpu.memory_space<vmem>>, vector<8x32xf32>
    %c0_2 = arith.constant 0 : index
    %c0_3 = arith.constant 0 : index
    %4 = vector.load %arg4[%c0_2, %c0_3] : memref<8x32xf32, #tpu.memory_space<vmem>>, vector<8x32xf32>
    %cst = arith.constant dense<0.000000e+00> : vector<8x8xf32>
    %5 = tpu.matmul %3, %4, %cst {dimension_numbers = #tpu.dot_dimension_numbers<[1], [1], [0], [0], [0, 0, 1, 0], [], []>} : vector<8x32xf32>, vector<8x32xf32>, vector<8x8xf32> -> vector<8x8xf32>
    %c0_4 = arith.constant 0 : index
    %c0_5 = arith.constant 0 : index
    %6 = vector.load %arg5[%c0_4, %c0_5] : memref<8x32xf32, #tpu.memory_space<vmem>>, vector<8x32xf32>
    %c0_6 = arith.constant 0 : index
    %c0_7 = arith.constant 0 : index
    %7 = vector.load %arg6[%c0_6, %c0_7] : memref<8x32xf32, #tpu.memory_space<vmem>>, vector<8x32xf32>
    %cst_8 = arith.constant dense<0.000000e+00> : vector<8x8xf32>
    %8 = tpu.matmul %6, %7, %cst_8 {dimension_numbers = #tpu.dot_dimension_numbers<[1], [1], [0], [0], [0, 0, 1, 0], [], []>} : vector<8x32xf32>, vector<8x32xf32>, vector<8x8xf32> -> vector<8x8xf32>
    %c0_9 = arith.constant 0 : index
    %c0_10 = arith.constant 0 : index
    %9 = vector.load %arg7[%c0_9, %c0_10] : memref<8x1xf32, #tpu.memory_space<vmem>>, vector<8x1xf32>
    %10 = vector.broadcast %9 : vector<8x1xf32> to vector<8x8xf32>
    %11 = arith.mulf %5, %10 : vector<8x8xf32>
    %c0_11 = arith.constant 0 : index
    %c0_12 = arith.constant 0 : index
    %12 = vector.load %arg8[%c0_11, %c0_12] : memref<1x8xf32, #tpu.memory_space<vmem>>, vector<1x8xf32>
    %13 = vector.broadcast %12 : vector<1x8xf32> to vector<8x8xf32>
    %14 = arith.mulf %11, %13 : vector<8x8xf32>
    %c0_13 = arith.constant 0 : index
    %c0_14 = arith.constant 0 : index
    %15 = vector.load %arg9[%c0_13, %c0_14] : memref<8x1xf32, #tpu.memory_space<vmem>>, vector<8x1xf32>
    %16 = vector.broadcast %15 : vector<8x1xf32> to vector<8x8xf32>
    %17 = arith.mulf %8, %16 : vector<8x8xf32>
    %c0_15 = arith.constant 0 : index
    %c0_16 = arith.constant 0 : index
    %18 = vector.load %arg10[%c0_15, %c0_16] : memref<1x8xf32, #tpu.memory_space<vmem>>, vector<1x8xf32>
    %19 = vector.broadcast %18 : vector<1x8xf32> to vector<8x8xf32>
    %20 = arith.mulf %17, %19 : vector<8x8xf32>
    %21 = arith.subf %20, %14 : vector<8x8xf32>
    %22 = arith.index_cast %arg0 : i32 to index
    %23 = memref.load %arg1[%22] : memref<1xi32, #tpu.memory_space<smem>>
    %24 = arith.index_cast %arg0 : i32 to index
    %25 = memref.load %arg2[%24] : memref<1xi32, #tpu.memory_space<smem>>
    %26 = arith.cmpi eq, %23, %25 : i32
    %cst_17 = arith.constant 1.000000e+00 : f32
    %cst_18 = arith.constant 2.000000e+00 : f32
    %27 = arith.select %26, %cst_17, %cst_18 : f32
    %c0_19 = arith.constant 0 : index
    %c0_20 = arith.constant 0 : index
    %28 = vector.load %arg12[%c0_19, %c0_20] : memref<1x1xf32, #tpu.memory_space<vmem>>, vector<1x1xf32>
    %29 = arith.mulf %21, %21 : vector<8x8xf32>
    %30 = vector.shape_cast %29 : vector<8x8xf32> to vector<1x8x8xf32>
    %cst_21 = arith.constant dense<0.000000e+00> : vector<1xf32>
    %31 = vector.multi_reduction <add>, %30, %cst_21 [1, 2] : vector<1x8x8xf32> to vector<1xf32>
    %32 = vector.shape_cast %31 : vector<1xf32> to vector<1x1x1xf32>
    %33 = vector.extract %32[0, 0, 0] : f32 from vector<1x1x1xf32>
    %34 = vector.broadcast %33 : f32 to vector<1x1xf32>
    %35 = vector.broadcast %27 : f32 to vector<1x1xf32>
    %36 = arith.mulf %35, %34 : vector<1x1xf32>
    %37 = arith.addf %28, %36 : vector<1x1xf32>
    %c0_22 = arith.constant 0 : index
    %c0_23 = arith.constant 0 : index
    %38 = vector.load %arg12[%c0_22, %c0_23] : memref<1x1xf32, #tpu.memory_space<vmem>>, vector<1x1xf32>
    tpu.vector_store %arg12[%c0_22, %c0_23], %37 {strides = array<i32>} : memref<1x1xf32, #tpu.memory_space<vmem>>, vector<1x1xf32>,
    %c0_i32_24 = arith.constant 0 : i32
    %39 = arith.cmpi eq, %arg0, %c0_i32_24 : i32
    %40 = arith.extui %39 : i1 to i32
    %c0_i32_25 = arith.constant 0 : i32
    %41 = arith.cmpi ne, %40, %c0_i32_25 : i32
    scf.if %41 {
      %c0_26 = arith.constant 0 : index
      %c0_27 = arith.constant 0 : index
      %42 = vector.load %arg12[%c0_26, %c0_27] : memref<1x1xf32, #tpu.memory_space<vmem>>, vector<1x1xf32>
      %43 = math.sqrt %42 : vector<1x1xf32>
      %c0_28 = arith.constant 0 : index
      %c0_29 = arith.constant 0 : index
      %44 = vector.load %arg11[%c0_28, %c0_29] : memref<1x1xf32, #tpu.memory_space<vmem>>, vector<1x1xf32>
      tpu.vector_store %arg11[%c0_28, %c0_29], %43 {strides = array<i32>} : memref<1x1xf32, #tpu.memory_space<vmem>>, vector<1x1xf32>,
    } else {
    }
    return
  }
  func.func @transform_0(%arg0: i32, %arg1: memref<1xi32, #tpu.memory_space<smem>>, %arg2: memref<1xi32, #tpu.memory_space<smem>>) -> (i32, i32) {
    %0 = arith.index_cast %arg0 : i32 to index
    %1 = memref.load %arg1[%0] : memref<1xi32, #tpu.memory_space<smem>>
    %c0_i32 = arith.constant 0 : i32
    %c0_i32_0 = arith.constant 0 : i32
    return %1, %c0_i32 : i32, i32
  }
  func.func @transform_1(%arg0: i32, %arg1: memref<1xi32, #tpu.memory_space<smem>>, %arg2: memref<1xi32, #tpu.memory_space<smem>>) -> (i32, i32) {
    %0 = arith.index_cast %arg0 : i32 to index
    %1 = memref.load %arg2[%0] : memref<1xi32, #tpu.memory_space<smem>>
    %c0_i32 = arith.constant 0 : i32
    %c0_i32_0 = arith.constant 0 : i32
    return %1, %c0_i32 : i32, i32
  }
  func.func @transform_2(%arg0: i32, %arg1: memref<1xi32, #tpu.memory_space<smem>>, %arg2: memref<1xi32, #tpu.memory_space<smem>>) -> (i32, i32) {
    %0 = arith.index_cast %arg0 : i32 to index
    %1 = memref.load %arg1[%0] : memref<1xi32, #tpu.memory_space<smem>>
    %c0_i32 = arith.constant 0 : i32
    %c0_i32_0 = arith.constant 0 : i32
    return %1, %c0_i32 : i32, i32
  }
  func.func @transform_3(%arg0: i32, %arg1: memref<1xi32, #tpu.memory_space<smem>>, %arg2: memref<1xi32, #tpu.memory_space<smem>>) -> (i32, i32) {
    %0 = arith.index_cast %arg0 : i32 to index
    %1 = memref.load %arg2[%0] : memref<1xi32, #tpu.memory_space<smem>>
    %c0_i32 = arith.constant 0 : i32
    %c0_i32_0 = arith.constant 0 : i32
    return %1, %c0_i32 : i32, i32
  }
  func.func @transform_4(%arg0: i32, %arg1: memref<1xi32, #tpu.memory_space<smem>>, %arg2: memref<1xi32, #tpu.memory_space<smem>>) -> (i32, i32) {
    %0 = arith.index_cast %arg0 : i32 to index
    %1 = memref.load %arg1[%0] : memref<1xi32, #tpu.memory_space<smem>>
    %c0_i32 = arith.constant 0 : i32
    %c0_i32_0 = arith.constant 0 : i32
    return %1, %c0_i32 : i32, i32
  }
  func.func @transform_5(%arg0: i32, %arg1: memref<1xi32, #tpu.memory_space<smem>>, %arg2: memref<1xi32, #tpu.memory_space<smem>>) -> (i32, i32) {
    %0 = arith.index_cast %arg0 : i32 to index
    %1 = memref.load %arg2[%0] : memref<1xi32, #tpu.memory_space<smem>>
    %c0_i32 = arith.constant 0 : i32
    %c0_i32_0 = arith.constant 0 : i32
    return %c0_i32, %1 : i32, i32
  }
  func.func @transform_6(%arg0: i32, %arg1: memref<1xi32, #tpu.memory_space<smem>>, %arg2: memref<1xi32, #tpu.memory_space<smem>>) -> (i32, i32) {
    %0 = arith.index_cast %arg0 : i32 to index
    %1 = memref.load %arg1[%0] : memref<1xi32, #tpu.memory_space<smem>>
    %c0_i32 = arith.constant 0 : i32
    %c0_i32_0 = arith.constant 0 : i32
    return %1, %c0_i32 : i32, i32
  }
  func.func @transform_7(%arg0: i32, %arg1: memref<1xi32, #tpu.memory_space<smem>>, %arg2: memref<1xi32, #tpu.memory_space<smem>>) -> (i32, i32) {
    %0 = arith.index_cast %arg0 : i32 to index
    %1 = memref.load %arg2[%0] : memref<1xi32, #tpu.memory_space<smem>>
    %c0_i32 = arith.constant 0 : i32
    %c0_i32_0 = arith.constant 0 : i32
    return %c0_i32, %1 : i32, i32
  }
  func.func @transform_8(%arg0: i32, %arg1: memref<1xi32, #tpu.memory_space<smem>>, %arg2: memref<1xi32, #tpu.memory_space<smem>>) -> (i32, i32) {
    %c0_i32 = arith.constant 0 : i32
    %c0_i32_0 = arith.constant 0 : i32
    %c0_i32_1 = arith.constant 0 : i32
    return %c0_i32, %c0_i32_0 : i32, i32
  }
}

</mosaic_0001>

<bundles_post_ra>
// kernel: tpu_custom_call.1
= control target key start
LH: loop header
LB: loop body
LE: loop exit
PB: predicated region body
PF: predicated region fallthrough
CT: control target
= control target key end

     0   :  { %v508_v0 = vmov 0.0   ;;  %s633_s0 = inlined_call_operand.<no memory space> [shape: s32[1], index: 0, kind: input, shape index: {}]   ;;  %s634_s1 = inlined_call_operand.<no memory space> [shape: s32[1], index: 1, kind: input, shape index: {}]   ;;  %s635_s2 = inlined_call_operand.vmem [shape: f32[8,32], index: 2, kind: input, shape index: {}]   ;;  %s636_s3 = inlined_call_operand.vmem [shape: f32[8,32], index: 3, kind: input, shape index: {}]   ;;  %s637_s4 = inlined_call_operand.vmem [shape: f32[8,32], index: 4, kind: input, shape index: {}]   ;;  %s638_s5 = inlined_call_operand.vmem [shape: f32[8,32], index: 5, kind: input, shape index: {}]   ;;  %s639_s6 = inlined_call_operand.vmem [shape: f32[8,1], index: 6, kind: input, shape index: {}]   ;;  %s640_s7 = inlined_call_operand.vmem [shape: f32[1,8], index: 7, kind: input, shape index: {}]   ;;  %s641_s8 = inlined_call_operand.vmem [shape: f32[8,1], index: 8, kind: input, shape index: {}]   ;;  %s642_s9 = inlined_call_operand.vmem [shape: f32[1,8], index: 9, kind: input, shape index: {}]   ;;  %s643_s10 = inlined_call_operand.hbm [shape: f32[1,1], index: 10, kind: output, shape index: {}]  }
   0x1   :  { %p125_p0 = scmp.lt.s32.totalorder %s634_s1, 0  ;;  %p119_p1 = scmp.lt.s32.totalorder %s633_s0, 0  ;;  %465 = vmatprep.subr.mxu0 %v508_v0  ;;  %470 = vmatprep.subr.mxu1 %v508_v0 }
   0x2   :  { %17 = vsyncpa [#allocation7], 0  ;;  %vm509_vm0 = vmmov 0   ;;  %v510_v1 = vmov 0   ;;  %vm172_vm1 = vcmask 261120   ;;  %vm364_vm2 = vcmask 64512   ;;  %p360_p2 = scmp.eq.s32.totalorder %s633_s0, %s634_s1 }
   0x3   :  { %s576_s19 = scalar_select %p125_p0, %s634_s1, 0  ;;  %467 = vmatprep.mubr.msk.f32.mxu0 %vm509_vm0, %v508_v0  ;;  %472 = vmatprep.mubr.msk.f32.mxu1 %vm509_vm0, %v508_v0  ;;  %vm168_vm3 = vcmask 0  }
   0x4   :  { %s120_s22 = scalar_select %p119_p1, %s633_s0, 0  ;;  %481 = vset.pattern.permute.xlu0 %v510_v1  ;;  %169 = vst.msk [vmem:[#allocation2] sm:$0x1] %vm168_vm3, %v508_v0 }
   0x5   :  { %s450_s23 = sshll.u32 %s576_s19, 3  ;;  %s511_s27 = smov [#allocation6]  }
   0x6   :  { %s128_s26 = scalar_lea.vmem %s636_s3, %s450_s23  ;;  %s140_s29 = scalar_lea.vmem %s638_s5, %s450_s23 }
   0x7   :  { %v171_v2 = vld [vmem:[%s128_s26] sm:$0xff]  ;;  %s449_s30 = sshll.u32 %s120_s22, 3  ;;  %s151_s22 = scalar_lea.vmem %s640_s7, %s576_s19 }
   0x8   :  { %v250_v3 = vld [vmem:[%s140_s29] sm:$0xff]  ;;  %466 = vmatpush3.xpose.msk.msra.mxu0 %vm172_vm1, %v171_v2  ;;  %s122_s13 = scalar_lea.vmem %s635_s2, %s449_s30  ;;  %s134_s3 = scalar_lea.vmem %s637_s4, %s449_s30 }
   0x9   :  { %471 = vmatpush3.xpose.msk.msra.mxu1 %vm172_vm1, %v250_v3  ;;  %v170_v4 = vld [vmem:[%s122_s13] sm:$0xff]  ;;  %s146_s17 = scalar_lea.vmem %s639_s6, %s449_s30  ;;  %s157_s21 = scalar_lea.vmem %s641_s8, %s449_s30 }
   0xa   :  { %v249_v5 = vld [vmem:[%s134_s3] sm:$0xff]  ;;  %s162_s6 = scalar_lea.vmem %s642_s9, %s576_s19  ;;  %s399_s28 = sshll.u32 %s511_s27, 4  ;;  %s400_s28 = int_to_ptr.vmem [resolvable:$true] %s399_s28 }
   0xb   :  { %v327_v6 = vld [vmem:[%s146_s17] sm:$0xff]  ;;  %468 = vmatmul.mubr.msk.f32.vlgmr.msra.gmra.mrb[0].mxu0 %vm172_vm1, %v170_v4  ;;  %s361_s25 = scalar_select %p360_p2, 1.0, 2.0 }
   0xc   :  { %473 = vmatmul.mubr.msk.f32.vlgmr.msra.gmra.mrb[0].mxu1 %vm172_vm1, %v249_v5  ;;  %330 = vperm.xlu0 %481, %v327_v6   ;;  %v342_v7 = vld [vmem:[%s157_s21] sm:$0xff]  ;;  %s484_s0 = scalar_lea.vmem %s400_s28, 16  ;;  %s488_s1 = scalar_lea.vmem %s400_s28, 32 }
   0xd   :  { %v459_v11 = vld [vmem:[%s151_s22] ss:$0 sm:$0xff]  ;;  %v376_v30 = vstv %s361_s25  ;;  %p485_p3 = scmp.ne.s32.totalorder %s400_s28, %s484_s0  ;;  %p489_p4 = scmp.lt.s32.totalorder %s400_s28, %s400_s28 }
   0xe   :  { %v460_v13 = vld [vmem:[%s162_s6] ss:$0 sm:$0xff]  ;;  %p490_p5 = scmp.lt.s32.totalorder %s488_s1, %s484_s0 }
   0xf   :  { %v362_v31 = vld [vmem:[#allocation2] sm:$0x1] }
  0x10   :  { %345 = vperm.xlu0 %481, %v342_v7   ;;  %p491_p6 = por %p490_p5, %p489_p4 }
  0x12   :  { %p492_p7 = pnand %p491_p6, %p485_p3 }
  0x8b   :  { %v331_v8 = vpop.permute.xlu0 %330 }
  0x8f   :  { %v346_v9 = vpop.permute.xlu0 %345 }
  0xde   :  { %v245_v10 = vpop.f32.mrb[0].mxu0 }
  0xdf   :  { %v323_v12 = vpop.f32.mrb[0].mxu1  ;;  %v333_v14 = vmul.f32 %v331_v8, %v245_v10  ;;  %v469_v16 = vpop.f32.mrb[1].mxu0 }
  0xe0   :  { %v348_v15 = vmul.f32 %v346_v9, %v323_v12  ;;  %v474_v17 = vpop.f32.mrb[1].mxu1 }
  0xe1   :  { %v341_v18 = vmul.f32 %v459_v11, %v333_v14 }
  0xe2   :  { %v356_v19 = vmul.f32 %v460_v13, %v348_v15 }
  0xe4   :  { %v357_v20 = vsub.f32 %v356_v19, %v341_v18 }
  0xe6   :  { %v363_v21 = vmul.f32 %v357_v20, %v357_v20 }
  0xe8   :  { %v365_v22 = vsel %vm364_vm2, %v363_v21, 0.0 }
  0xe9   :  { %366 = vadd.xlane.f32.xlu1 %v365_v22 }
 0x176   :  { %v367_v23 = vpop.xlane.xlu1 %366 }
 0x177   :  { %v368_v24 = vrot.slane %v367_v23, 4 }
 0x179   :  { %v369_v25 = vadd.f32 %v368_v24, %v367_v23 }
 0x17b   :  { %v370_v26 = vrot.slane %v369_v25, 2 }
 0x17d   :  { %v371_v27 = vadd.f32 %v370_v26, %v369_v25 }
 0x17f   :  { %v372_v28 = vrot.slane %v371_v27, 1 }
 0x181   :  { %v373_v29 = vadd.f32 %v372_v28, %v371_v27 }
 0x183   :  { %475 = vpush %v373_v29 }
 0x1b4   :  { %s476_s26 = spop %475 }
 0x1b5   :  { %v375_v32 = vstv %s476_s26 }
 0x1b6   :  { %v377_v33 = vmul.f32 %v376_v30, %v375_v32 }
 0x1b8   :  { %v378_v34 = vadd.f32 %v377_v33, %v362_v31 }
 0x1ba   :  { %380 = vst.msk [vmem:[#allocation2] sm:$0x1] %vm168_vm3, %v378_v34 }
 0x1c1   :  { %v384_v35 = vld [vmem:[#allocation2] sm:$0x1] }
 0x1c2   :  { %482 = vrsqrt.f32 %v384_v35  ;;  %vm387_vm4 = vcmp.eq.f32.partialorder %v384_v35, inf  ;;  %v390_v38 = vand.u32 2147483648, %v384_v35  ;;  %vm389_vm5 = vcmp.eq.f32.partialorder %v384_v35, 0.0 }
 0x1cc   :  { %v483_v36 = vpop.eup %482 }
 0x1cd   :  { %v386_v37 = vmul.f32 %v483_v36, %v384_v35 }
 0x1cf   :  { %v388_v39 = vsel %vm387_vm4, %v384_v35, %v386_v37 }
 0x1d0   :  { %v391_v40 = vsel %vm389_vm5, %v390_v38, %v388_v39 }
 0x1d1   :  { %392 = vst.msk [vmem:[#allocation6] sm:$0x1] %vm168_vm3, %v391_v40 }
 0x1d2   :  { %495 = shalt.err (!%p492_p7)
}
 0x1d3   :  { %s496_s11 = scalar_lea.hbm %s643_s10, 16 }
 0x1d4   :  { %p497_p8 = scmp.ne.s32.totalorder %s643_s10, %s496_s11  ;;  %p500_p9 = scmp.lt.u32.totalorder %s496_s11, %s643_s10 }
 0x1d6   :  { %p502_p10 = pnand %p500_p9, %p497_p8 }
 0x1d8   :  { %505 = shalt.err (!%p502_p10)
}
 0x1d9   :  { %402 = dma.vmem_to_hbm [thread:$0]  %s400_s28, 16, %s643_s10, [#allocation7]  }
 0x1da   :  { %506 = dma.done.wait [#allocation7], 16  }
 0x1db   :  { %507 = vsyncadd [#allocation7], 4294967280 }
 0x1dc   :  { %406 = vsyncpa [#allocation7], 1 }

</bundles_post_ra>
